<compile_context>
chip_gen: v6e
topology: v6e:2x2x1
jax: 0.10.0
libtpu: 0.0.40
codegen_flags: <defaults>
</compile_context>

<pallas_src>
import math
import numpy as np

import jax
import jax.numpy as jnp
from jax.experimental import pallas as pl
from jax.experimental.pallas import tpu as pltpu


# ----------------------------------------------------------------------------
# e3nn-style real Wigner-3j matrices (constant setup, computed in numpy).
# ----------------------------------------------------------------------------
def _su2_cg(j1, m1, j2, m2, j3, m3):
    """Complex Clebsch-Gordan <j1 m1 j2 m2 | j3 m3> via the Racah formula."""
    if m3 != m1 + m2:
        return 0.0
    f = lambda n: math.factorial(int(round(n)))
    vmin = int(max(-j1 + j2 + m3, -j1 + m1, 0))
    vmax = int(min(j2 + j3 + m1, j3 - j1 + j2, j3 + m3))
    C = math.sqrt(
        (2.0 * j3 + 1.0)
        * f(j3 + j1 - j2) * f(j3 - j1 + j2) * f(j1 + j2 - j3) * f(j3 + m3) * f(j3 - m3)
        / (f(j1 + j2 + j3 + 1) * f(j1 - m1) * f(j1 + m1) * f(j2 - m2) * f(j2 + m2))
    )
    S = 0.0
    for v in range(vmin, vmax + 1):
        S += (-1.0) ** (v + j2 + m2) * (
            f(j2 + j3 + m1 - v) * f(j1 - m1 + v)
            / (f(v) * f(j3 - j1 + j2 - v) * f(j3 + m3 - v) * f(v + j1 - j2 - m3))
        )
    return C * S


def _su2_clebsch_gordan(j1, j2, j3):
    mat = np.zeros((2 * j1 + 1, 2 * j2 + 1, 2 * j3 + 1), dtype=np.float64)
    for m1 in range(-j1, j1 + 1):
        for m2 in range(-j2, j2 + 1):
            m3 = m1 + m2
            if abs(m3) <= j3:
                mat[j1 + m1, j2 + m2, j3 + m3] = _su2_cg(j1, m1, j2, m2, j3, m3)
    return mat


def _change_basis_real_to_complex(l):
    q = np.zeros((2 * l + 1, 2 * l + 1), dtype=np.complex128)
    for m in range(-l, 0):
        q[l + m, l + abs(m)] = 1.0 / math.sqrt(2.0)
        q[l + m, l - abs(m)] = -1j / math.sqrt(2.0)
    q[l, l] = 1.0
    for m in range(1, l + 1):
        q[l + m, l + abs(m)] = (-1.0) ** m / math.sqrt(2.0)
        q[l + m, l - abs(m)] = 1j * (-1.0) ** m / math.sqrt(2.0)
    return (-1j) ** l * q


def wigner_3j(l1, l2, l3):
    """Real Wigner-3j tensor, shape (2l1+1, 2l2+1, 2l3+1), e3nn convention."""
    Q1 = _change_basis_real_to_complex(l1)
    Q2 = _change_basis_real_to_complex(l2)
    Q3 = _change_basis_real_to_complex(l3)
    C = _su2_clebsch_gordan(l1, l2, l3).astype(np.complex128)
    C = np.einsum("ij,kl,mn,ikn->jlm", Q1, Q2, np.conj(Q3.T), C)
    assert np.all(np.abs(C.imag) < 1e-9)
    C = C.real
    C = C / np.linalg.norm(C)
    return C.astype(np.float32)


# ----------------------------------------------------------------------------
# Irreps bookkeeping (all even parity -> selection rule is |l1-l2|<=l_in<=l1+l2)
# ----------------------------------------------------------------------------
IRREP_IN = [(8, 0), (8, 1)]             # "8x0e + 8x1e"  -> dim 32
IRREP_OUT_1 = [(4, 0), (2, 1), (1, 2)]  # "4x0e + 2x1e + 1x2e" -> dim 15
IRREP_OUT_2 = [(3, 0), (2, 1), (1, 2)]  # "3x0e + 2x1e + 1x2e" -> dim 14


def prod(xs):
    p = 1
    for v in xs:
        p *= v
    return p


def irrep_dim(irreps):
    return sum(mul * (2 * l + 1) for mul, l in irreps)


def irrep_offsets(irreps):
    offs, o = [], 0
    for mul, l in irreps:
        offs.append(o)
        o += mul * (2 * l + 1)
    return offs


def get_expansion_path(irrep_in, irrep_out_1, irrep_out_2):
    instructions = []
    for i, (mi, li) in enumerate(irrep_in):
        for j, (m1, l1) in enumerate(irrep_out_1):
            for k, (m2, l2) in enumerate(irrep_out_2):
                if abs(l1 - l2) <= li <= l1 + l2:
                    instructions.append([i, j, k, True, 1.0, [mi, m1, m2]])
    return instructions


INSTRUCTIONS = get_expansion_path(IRREP_IN, IRREP_OUT_1, IRREP_OUT_2)
NUM_PATH_WEIGHT = sum(prod(ins[-1]) for ins in INSTRUCTIONS if ins[3])
NUM_BIAS = sum(prod(ins[-1][1:]) for ins in INSTRUCTIONS if ins[0] == 0)
NUM_WEIGHTS = NUM_PATH_WEIGHT + NUM_BIAS


# ----------------------------------------------------------------------------
# Fold constants (path weights x wigner-3j) into the 2-D expansion matrix E2d.
# Done ONCE per set of weights (hoisted out of the forward call).
# (NB: like the PyTorch weights=None path, only the first NUM_PATH_WEIGHT
#  entries of `weights` are consumed; the bias tail is unused in this branch.)
# ----------------------------------------------------------------------------
def build_expansion_matrix(weights_np):
    Din = irrep_dim(IRREP_IN)
    D1 = irrep_dim(IRREP_OUT_1)
    D2 = irrep_dim(IRREP_OUT_2)
    in_off = irrep_offsets(IRREP_IN)
    o1 = irrep_offsets(IRREP_OUT_1)
    o2 = irrep_offsets(IRREP_OUT_2)

    E = np.zeros((Din, D1, D2), dtype=np.float64)
    flat = 0
    for i, j, k, has_w, _, pshape in INSTRUCTIONS:
        mi, li = IRREP_IN[i]
        m1, l1 = IRREP_OUT_1[j]
        m2, l2 = IRREP_OUT_2[k]
        di, d1, d2 = 2 * li + 1, 2 * l1 + 1, 2 * l2 + 1
        n = prod(pshape)
        w = weights_np[flat:flat + n].reshape(pshape)
        flat += n
        w3j = wigner_3j(l1, l2, li)                      # (d1, d2, di)
        # result[b,u,i',v,j'] = sum_{w,k'} w[w,u,v] * w3j[i',j',k'] * x1[b,w,k'] / mi
        blk = np.einsum('wuv,ijk->wkuivj', w, w3j) / mi  # (mi, di, m1, d1, m2, d2)
        blk = blk.reshape(mi * di, m1 * d1, m2 * d2)
        E[in_off[i]:in_off[i] + mi * di,
          o1[j]:o1[j] + m1 * d1,
          o2[k]:o2[k] + m2 * d2] += blk
    return E.reshape(Din, D1 * D2).astype(np.float32)


# ----------------------------------------------------------------------------
# Pallas kernel: batch-tiled contraction  out_tile = x_tile @ E2d
#   x_ref: (TILE_B, Din) f32 (cast to bf16 in-register),
#   e_ref: (Din, Dout)   bf16, VMEM-resident across all grid steps,
#   o_ref: (TILE_B, Dout) out dtype, f32 MXU accumulation.
# ----------------------------------------------------------------------------
def _expansion_matmul_kernel(x_ref, e_ref, o_ref):
    o_ref[...] = jnp.dot(
        x_ref[...].astype(jnp.bfloat16), e_ref[...],
        preferred_element_type=jnp.float32,
    ).astype(o_ref.dtype)


def _round_up(n, m):
    return ((n + m - 1) // m) * m


def prepare_expansion_operand(weights):
    """Fold the module weights into the bf16 (Din, D1*D2) matmul operand once."""
    return jnp.asarray(build_expansion_matrix(np.asarray(weights)),
                       dtype=jnp.bfloat16)


def expansion_forward(x_in, e2d_bf16, d1, d2, *, tile_b=2048,
                      out_dtype=jnp.float32, small_batch_rows=0,
                      flat_output=False):
    """x_in: (B, Din) f32, e2d_bf16: (Din, D1*D2) bf16 -> (B, D1, D2) out_dtype.

    tile_b: batch rows per grid step (default 2048: amortizes the ~0.35 us/step
      pipeline overhead; f32-out double buffer ~3.5 MiB -> fits v7x's 64 MiB
      VMEM with lots of headroom; cap at ~8192 on v7x if raised further).
    small_batch_rows: below this many rows, dispatch to a plain XLA dot (the
      pallas_call fixed cost dominates in that regime).
    out_dtype: pass jnp.bfloat16 if the consumer tolerates bf16 activations
      (output bytes are ~94% of HBM traffic -> ~1.8x kernel speedup).
    flat_output: return (B, D1*D2) and skip the trailing reshape.
    """
    B, Din = x_in.shape
    K, Dout = e2d_bf16.shape
    assert K == Din and Dout == d1 * d2

    if B <= small_batch_rows:
        # Small-batch fast path: let XLA fuse a plain dot; no pallas fixed cost.
        out2d = jnp.dot(x_in.astype(jnp.bfloat16), e2d_bf16,
                        preferred_element_type=jnp.float32).astype(out_dtype)
    else:
        tile = int(min(_round_up(tile_b, 8), _round_up(B, 8)))
        grid = (pl.cdiv(B, tile),)   # ragged last block handled by Pallas

        out_bytes = np.dtype(out_dtype).itemsize
        cost = pl.CostEstimate(
            flops=2 * B * Din * Dout,
            transcendentals=0,
            bytes_accessed=(B * Din * np.dtype(x_in.dtype).itemsize
                            + Din * Dout * 2
                            + B * Dout * out_bytes),
        )

        out2d = pl.pallas_call(
            _expansion_matmul_kernel,
            out_shape=jax.ShapeDtypeStruct((B, Dout), out_dtype),
            grid=grid,
            in_specs=[
                # x: one batch tile per grid step (double-buffered stream).
                pl.BlockSpec((tile, Din), lambda i: (i, 0)),
                # E: same block every step -> stays resident in VMEM, no re-DMA.
                pl.BlockSpec((Din, Dout), lambda i: (0, 0)),
            ],
            # Block last dim == full array dim (210): legal, writes go straight
            # to the un-padded (B, 210) output -> no epilogue slice/copy.
            out_specs=pl.BlockSpec((tile, Dout), lambda i: (i, 0)),
            compiler_params=pltpu.CompilerParams(
                # Batch steps are independent -> shard across v7x's 2 TensorCores.
                dimension_semantics=("parallel",),
            ),
            cost_estimate=cost,
        )(x_in, e2d_bf16)

    if flat_output:
        return out2d
    return out2d.reshape(B, d1, d2)


# TODO(synk): the external `weights`/`bias_weights` branch (per-batch path
# weights + bias) of Expansion.forward is not implemented; this reproduces the
# default weights=None path that uses the module's own self.weights.


# ----------------------------------------------------------------------------
# Pure-JAX reference mirroring the PyTorch forward (per-instruction einsums,
# f32 / HIGHEST precision).
# ----------------------------------------------------------------------------
def expansion_reference(x_in, weights):
    B = x_in.shape[0]
    in_off = irrep_offsets(IRREP_IN)
    x_in_s = [
        x_in[:, off:off + mul * (2 * l + 1)].reshape(B, mul, 2 * l + 1)
        for (mul, l), off in zip(IRREP_IN, in_off)
    ]
    outputs = {}
    flat = 0
    for i, j, k, has_w, _, pshape in INSTRUCTIONS:
        mi, li = IRREP_IN[i]
        m1, l1 = IRREP_OUT_1[j]
        m2, l2 = IRREP_OUT_2[k]
        n = prod(pshape)
        w = weights[flat:flat + n].reshape(pshape)
        flat += n
        w3j = jnp.asarray(wigner_3j(l1, l2, li))
        result = jnp.einsum('wuv,ijk,bwk->buivj', w, w3j, x_in_s[i],
                            precision=jax.lax.Precision.HIGHEST) / mi
        result = result.reshape(B, m1 * (2 * l1 + 1), m2 * (2 * l2 + 1))
        key = (j, k)
        outputs[key] = outputs[key] + result if key in outputs else result

    rows = []
    for jj, (m1, l1) in enumerate(IRREP_OUT_1):
        blocks = []
        for kk, (m2, l2) in enumerate(IRREP_OUT_2):
            d1 = m1 * (2 * l1 + 1)
            d2 = m2 * (2 * l2 + 1)
            if (jj, kk) not in outputs:
                blocks.append(jnp.zeros((B, d1, d2), dtype=x_in.dtype))
            else:
                blocks.append(outputs[(jj, kk)])
        rows.append(jnp.concatenate(blocks, axis=-1))
    return jnp.concatenate(rows, axis=-2)


# ----------------------------------------------------------------------------
if __name__ == "__main__":
    key = jax.random.PRNGKey(0)
    kx, kw = jax.random.split(key)

    B = 100                      # deliberately NOT a multiple of the tile
    Din = irrep_dim(IRREP_IN)    # 32
    D1 = irrep_dim(IRREP_OUT_1)  # 15
    D2 = irrep_dim(IRREP_OUT_2)  # 14

    x = jax.random.normal(kx, (B, Din), dtype=jnp.float32)
    # analogue of nn.Parameter(torch.rand(num_path_weight + num_bias)):
    weights = jax.random.uniform(kw, (NUM_WEIGHTS,), dtype=jnp.float32)

    # Hoisted once: fold weights * wigner3j / mul into the bf16 matmul operand.
    e2d = prepare_expansion_operand(weights)

    ref = expansion_reference(x, weights)

    # Pallas path: small tile (multiple of 8) so the demo exercises a
    # multi-step grid with a ragged last block; production uses tile_b=2048.
    out = expansion_forward(x, e2d, D1, D2, tile_b=32)
    out = jax.block_until_ready(out)
    assert out.shape == (B, D1, D2)
    # bf16 operands / f32 accumulation on the MXU: tolerance sized for bf16.
    np.testing.assert_allclose(np.asarray(out), np.asarray(ref),
                               rtol=2e-2, atol=2e-2)

    # Small-batch XLA fast path sanity check (dispatch below the threshold).
    out_small = expansion_forward(x[:7], e2d, D1, D2, tile_b=32,
                                  small_batch_rows=16)
    out_small = jax.block_until_ready(out_small)
    np.testing.assert_allclose(np.asarray(out_small), np.asarray(ref)[:7],
                               rtol=2e-2, atol=2e-2)

    print("KERNEL_OK")
</pallas_src>

<mosaic_0001>
module attributes {stable_mosaic.version = 11 : i64} {
  func.func @_expansion_matmul_kernel(%arg0: i32, %arg1: memref<32x32xf32, #tpu.memory_space<vmem>>, %arg2: memref<32x210xbf16, #tpu.memory_space<vmem>>, %arg3: memref<32x210xf32, #tpu.memory_space<vmem>>) attributes {dimension_semantics = [#tpu.dimension_semantics<parallel>], iteration_bounds = array<i64: 4>, scalar_prefetch = 0 : i64, scratch_operands = 0 : i64, tpu.core_type = #tpu.core_type<tc>, window_params = [{transform_indices = @transform_0, window_bounds = array<i64: 32, 32>}, {pipeline_mode = #tpu.pipeline_mode<synchronous>, transform_indices = @transform_1, window_bounds = array<i64: 32, 210>}, {transform_indices = @transform_2, window_bounds = array<i64: 32, 210>}]} {
    %c0 = arith.constant 0 : index
    %c0_0 = arith.constant 0 : index
    %0 = vector.load %arg1[%c0, %c0_0] : memref<32x32xf32, #tpu.memory_space<vmem>>, vector<32x32xf32>
    %1 = arith.truncf %0 : vector<32x32xf32> to vector<32x32xbf16>
    %c0_1 = arith.constant 0 : index
    %c0_2 = arith.constant 0 : index
    %2 = vector.load %arg2[%c0_1, %c0_2] : memref<32x210xbf16, #tpu.memory_space<vmem>>, vector<32x210xbf16>
    %cst = arith.constant dense<0.000000e+00> : vector<32x210xf32>
    %3 = tpu.matmul %1, %2, %cst {dimension_numbers = #tpu.dot_dimension_numbers<[1], [0], [0], [1], [0, 0, 1, 1], [], []>} : vector<32x32xbf16>, vector<32x210xbf16>, vector<32x210xf32> -> vector<32x210xf32>
    %c0_3 = arith.constant 0 : index
    %c0_4 = arith.constant 0 : index
    %4 = vector.load %arg3[%c0_3, %c0_4] : memref<32x210xf32, #tpu.memory_space<vmem>>, vector<32x210xf32>
    tpu.vector_store %arg3[%c0_3, %c0_4], %3 {strides = array<i32>} : memref<32x210xf32, #tpu.memory_space<vmem>>, vector<32x210xf32>,
    return
  }
  func.func @transform_0(%arg0: i32) -> (i32, i32) {
    %c0_i32 = arith.constant 0 : i32
    %c0_i32_0 = arith.constant 0 : i32
    return %arg0, %c0_i32 : i32, i32
  }
  func.func @transform_1(%arg0: i32) -> (i32, i32) {
    %c0_i32 = arith.constant 0 : i32
    %c0_i32_0 = arith.constant 0 : i32
    %c0_i32_1 = arith.constant 0 : i32
    return %c0_i32, %c0_i32_0 : i32, i32
  }
  func.func @transform_2(%arg0: i32) -> (i32, i32) {
    %c0_i32 = arith.constant 0 : i32
    %c0_i32_0 = arith.constant 0 : i32
    return %arg0, %c0_i32 : i32, i32
  }
}

</mosaic_0001>

<bundles_post_ra>
// kernel: tpu_custom_call.1
= control target key start
LH: loop header
LB: loop body
LE: loop exit
PB: predicated region body
PF: predicated region fallthrough
CT: control target
= control target key end

     0   :  { %7 = vsyncpa [#allocation3], 0  ;;  %s645_s0 = inlined_call_operand.vmem [shape: f32[100,32], index: 0, kind: input, shape index: {}]   ;;  %s646_s1 = inlined_call_operand.vmem [shape: bf16[32,210], index: 1, kind: input, shape index: {}]   ;;  %s647_s2 = inlined_call_operand.hbm [shape: f32[100,210], index: 2, kind: output, shape index: {}]  }
   0x1   :  { %9 = vsyncpa [#allocation3 + $0x1], 0  ;;  %s513_s9 = smov 0   ;;  %s515_s10 = smov 0  }
   0x2   :  { %s517_s11 = smov 0   ;;  %s519_s12 = smov 0  }
   0x3 LB: > { %s534_s13 = sadd.s32 4294967295, %s492_s12   ;;  %s354_s14 = sadd.s32 4294967294, %s492_s12   ;;  %s492_s12 = sphi %s519_s12, %s653_s12   ;;  %s488_s11 = sphi %s517_s11, %s652_s11   ;;  %s484_s10 = sphi %s515_s10, %s651_s10   ;;  %s480_s9 = sphi %s513_s9, %s650_s9  }
   0x4   : > { %s538_s15 = sadd.s32 1, %s492_s12   ;;  %s69_s16 = sadd.s32 1, %s488_s11 }
   0x5   : > { %s66_s17 = ssub.s32 %s492_s12, %s538_s15  ;;  %p79_p0 = scmp.ne.s32.totalorder %s488_s11, %s484_s10 }
   0x6   : > { %p67_p1 = scmp.eq.s32.totalorder %s66_s17, 0  ;;  %p80_p2 = scmp.eq.s32.totalorder %s534_s13, 3 }
   0x7   : > { %p85_p3 = scmp.ne.s32.totalorder %s484_s10, %s480_s9  ;;  %p86_p4 = scmp.eq.s32.totalorder %s354_s14, 3 }
   0x8   : > { %s549_s18 = scalar_select %p67_p1, %s488_s11, %s69_s16  }
   0x9   : > { %p551_p5 = por %p80_p2, %p79_p0  ;;  %p555_p6 = por %p86_p4, %p85_p3 }
   0xa   : > { %p357_p7 = scmp.ge.s32.totalorder %s492_s12, 1  ;;  %p124_p8 = scmp.lt.s32.totalorder %s492_s12, 5 }
   0xc   : > { %p125_p9 = pnand %p357_p7, %p124_p8 }
   0xd   : > { %s565_s23 = sshll.u32 (!%p125_p9), %s534_s13, 2  ;;  %s147_s7 = sand.u32 (!%p125_p9), 1, %s484_s10  }
   0xe   : > { %128 = sbr.rel (%p125_p9) target bundleno = 256 (0x100), region = 28  ;;  %p155_p10 = scmp.lt.s32.totalorder (!%p125_p9), %s565_s23, 12 }
   0xf   : > { %s358_s8 = sshll.u32 (!%p125_p9), %s147_s7, 6  ;;  %s586_s16 = scalar_lea.sflag (!%p125_p9), [#allocation3], %s147_s7 }
  0x10   : > { %s149_s14 = scalar_lea.vmem (!%p125_p9), [#allocation2], %s358_s8 }
  0x13   : > { %v426_v0 = vld [vmem:[%s646_s1 + $0x14] ss:$8 sps:$4 sm:$0xff]   ;;  %v428_v1 = vld [vmem:[%s646_s1 + $0x10] ss:$8 sps:$4 sm:$0xff]   ;;  %v494_v2 = vmov 0   ;;  %s156_s30 = scalar_select %p155_p10, %s565_s23, 12 }
  0x14   : > { %240 = vmatprep.mubr.bf16.mxu0 %v494_v2  ;;  %250 = vmatprep.mubr.bf16.mxu1 %v494_v2  ;;  %v429_v3 = vld [vmem:[%s646_s1 + $0x4] ss:$8 sps:$4 sm:$0xff]   ;;  %v431_v4 = vld [vmem:[%s646_s1] ss:$8 sps:$4 sm:$0xff]   ;;  %vm201_vm0 = vcmask 261120   ;;  %vm262_vm1 = vcmask 670720  }
  0x15   : > { %220 = vmatprep.subr.bf16.mxu0 %v426_v0  ;;  %381 = vmatprep.subr.bf16.mxu1 %v426_v0  ;;  %s360_s3 = sshll.u32 %s156_s30, 3  ;;  %s279_s17 = ssub.s32 (%p551_p5), 13, %s565_s23 }
  0x16   : > { %221 = vmatpush1.bf16.msra.mxu0 %v428_v1  ;;  %383 = vmatpush1.bf16.msra.mxu1 %v428_v1  ;;  %s158_s6 = scalar_lea.vmem %s645_s0, %s360_s3  ;;  %p280_p11 = scmp.lt.s32.totalorder (%p551_p5), %s279_s17, 4 }
  0x17   : > { %222 = vmatprep.subr.bf16.mxu0 %v429_v3  ;;  %382 = vmatprep.subr.bf16.mxu1 %v429_v3  ;;  %v171_v5 = vld [vmem:[%s158_s6] sm:$0xff]  ;;  %v172_v6 = vld [vmem:[%s158_s6 + $0x8] sm:$0xff]  ;;  %v173_v7 = vld [vmem:[%s158_s6 + $0x10] sm:$0xff] }
  0x18   : > { %v175_v8 = vpack.c.bf16 %v172_v6, %v171_v5  ;;  %v174_v9 = vld [vmem:[%s158_s6 + $0x18] sm:$0xff] }
  0x19   : > { %v176_v10 = vpack.c.bf16 %v174_v9, %v173_v7 }
  0x1a   : > { %223 = vmatpush1.bf16.msra.mxu0 %v431_v4  ;;  %384 = vmatpush1.bf16.msra.mxu1 %v431_v4 }
  0x1d   : > { %365 = vmatmul.mubr.msk.bf16.vlgmr.msra.gmra.mxu0 %vm201_vm0, %v175_v8  ;;  %366 = vmatmul.mubr.msk.bf16.vlgmr.msra.gmra.mxu1 %vm201_vm0, %v176_v10 }
  0xdd   : > { %v242_v11 = vpop.f32.mrf.mxu0  ;;  %v252_v12 = vpop.f32.mrf.mxu1 }
  0xde   : > { %261 = vst [vmem:[%s149_s14] sm:$0xff] %v242_v11  ;;  %266 = vst [vmem:[%s149_s14 + $0x20] sm:$0xff] %v252_v12 }
  0xdf   : > { %v244_v13 = vpop.f32.mrf.mxu0  ;;  %v254_v14 = vpop.f32.mrf.mxu1 }
  0xe0   : > { %263 = vst.msk [vmem:[%s149_s14 + $0x8] sm:$0xff] %vm262_vm1, %v244_v13  ;;  %267 = vst.msk [vmem:[%s149_s14 + $0x28] sm:$0xff] %vm262_vm1, %v254_v14  ;;  %277 = sbr.rel (!%p551_p5) target bundleno = 256 (0x100), region = 32 }
  0xe1   : > { %v246_v15 = vpop.f32.mrf.mxu0  ;;  %v256_v16 = vpop.f32.mrf.mxu1 }
  0xe2   : > { %264 = vst [vmem:[%s149_s14 + $0x10] sm:$0xff] %v246_v15  ;;  %268 = vst [vmem:[%s149_s14 + $0x30] sm:$0xff] %v256_v16 }
  0xe3   : > { %v248_v17 = vpop.f32.mrf.mxu0  ;;  %v258_v18 = vpop.f32.mrf.mxu1 }
  0xe4   : > { %265 = vst.msk [vmem:[%s149_s14 + $0x18] sm:$0xff] %vm262_vm1, %v248_v17  ;;  %269 = vst.msk [vmem:[%s149_s14 + $0x38] sm:$0xff] %vm262_vm1, %v258_v18 }
  0xe5   : > { %s655_s17 = smov (!%p280_p11, %s279_s17), 4 }
  0xe6   : > { %s591_s21 = sshll.u32 %s655_s17, 8 }
  0xe7   : > { %s285_s22 = ssub.s32 1024, %s591_s21 }
  0xe8   : > { %286 = vsyncadd %s586_s16, %s285_s22  ;;  %p371_p12 = scmp.ne.s32.totalorder %s591_s21, 0  ;;  %s380_s24 = sshll.u32 %s534_s13, 10 }
  0xe9   : > { %s600_s19 = scalar_lea.hbm %s647_s2, %s380_s24  ;;  %s292_s27 = sshll.u32 %s149_s14, 4  ;;  %s602_s27 = int_to_ptr.vmem [resolvable:$true] %s292_s27 }
  0xea   : > { %s432_s23 = scalar_lea.vmem %s602_s27, %s591_s21  ;;  %s495_s28 = smov [#allocation2]  }
  0xeb   : > { %p433_p13 = scmp.ne.s32.totalorder %s602_s27, %s432_s23  ;;  %s436_s29 = sshll.u32 %s495_s28, 4  ;;  %s437_s29 = int_to_ptr.vmem [resolvable:$false] %s436_s29 }
  0xec   : > { %s438_s13 = scalar_lea.vmem %s437_s29, 2048  ;;  %p439_p2 = scmp.lt.s32.totalorder %s602_s27, %s437_s29 }
  0xed   : > { %p434_p0 = pnand %p433_p13, %p371_p12  ;;  %p440_p3 = scmp.lt.s32.totalorder %s438_s13, %s432_s23 }
  0xef   : > { %p435_p1 = pneg %p434_p0  ;;  %p441_p4 = por %p440_p3, %p439_p2 }
  0xf1   : > { %p442_p5 = pnand %p441_p4, %p435_p1 }
  0xf3   : > { %445 = shalt.err (!%p442_p5)
}
  0xf4   : > { %s446_s30 = scalar_lea.hbm %s600_s19, %s591_s21  ;;  %s450_s5 = scalar_lea.hbm %s647_s2, 3328 }
  0xf5   : > { %p447_p7 = scmp.ne.s32.totalorder %s600_s19, %s446_s30  ;;  %p451_p10 = scmp.lt.s32.totalorder %s600_s19, %s647_s2 }
  0xf6   : > { %p452_p11 = scmp.lt.s32.totalorder %s450_s5, %s446_s30 }
  0xf7   : > { %p448_p8 = pnand %p447_p7, %p371_p12 }
  0xf8   : > { %p453_p13 = por %p452_p11, %p451_p10 }
  0xf9   : > { %p449_p9 = pneg %p448_p8 }
  0xfb   : > { %p454_p0 = pnand %p453_p13, %p449_p9 }
  0xfd   : > { %457 = shalt.err (!%p454_p0)
}
  0xfe   : > { %s496_s8 = smov 256   ;;  %s497_s14 = smov 16  }
  0xff   : > { %298 = dma.vmem_to_hbm [thread:$0]  (%p371_p12), %s602_s27, %s591_s21, %s600_s19, %s586_s16, %s496_s8, %s496_s8, %s497_s14  }
 0x100 PF: > { %p390_p1 = scmp.ge.s32.totalorder %s492_s12, 2  ;;  %s307_s17 = sand.u32 1, %s480_s9  }
 0x101   : > { %s308_s22 = scalar_lea.sflag [#allocation3], %s307_s17 }
 0x102   : > { %p387_p2 = pnand %p390_p1, %p555_p6 }
 0x104   : > { %p388_p3 = pneg %p387_p2 }
 0x106   : > { %475 = dma.done.wait (%p388_p3), %s308_s22, 1024  }
 0x107   : > { %477 = vsyncadd (%p388_p3), %s308_s22, 4294966272  ;;  %p12_p4 = scmp.ge.s32.totalorder %s538_s15, 6   ;;  %s650_s9 = smov %s484_s10 }
 0x108   : > { %s651_s10 = smov %s488_s11  ;;  %s652_s11 = smov %s549_s18 }
 0x109   : > { %s653_s12 = smov %s538_s15  ;;  %14 = sbr.rel (!%p12_p4) target bundleno = 3 (0x3), region = 63 }
 0x10e   :  { %313 = vsyncpa [#allocation3], 1 }
 0x10f   :  { %315 = vsyncpa [#allocation3 + $0x1], 1 }

</bundles_post_ra>
